<compile_context>
chip_gen: v7x
topology: tpu7x:2x2x1
jax: 0.10.0
libtpu: 0.0.40
codegen_flags: <defaults>
</compile_context>

<pallas_src>
import jax
import jax.numpy as jnp
from jax.experimental import pallas as pl
from jax.experimental.pallas import tpu as pltpu

_LANE = 128
_SUBLANE = 8
_NEG = -1e30  # additive mask value for padded class lanes


def _round_up(v, m):
    return (v + m - 1) // m * m


def _pad2d(a, rows, cols, dtype):
    r, c = a.shape
    return jnp.pad(a, ((0, rows - r), (0, cols - c))).astype(dtype)


def _vmem_budget_bytes():
    # Generation-aware VMEM budget: v5e/v6e have 128 MiB per TensorCore,
    # v7x has 64 MiB.  Leave ~25% headroom for compiler scratch.
    try:
        cap = int(pltpu.get_tpu_info().vmem_capacity_bytes)
    except Exception:
        cap = 64 * 1024 * 1024  # conservative fallback (v7x per-TC size)
    cap = max(32 * 1024 * 1024, min(cap, 128 * 1024 * 1024))
    return (cap * 3) // 4


# ----------------------------- fused kernel ---------------------------------
# Whole problem resident in VMEM: adj is DMA'd once, all three layers run
# back-to-back in a single launch.


def _fused_gcn_kernel(x_ref, adj_ref, w1_ref, b1_ref, w2_ref, b2_ref,
                      w3_ref, b3_ref, mask_ref, out_ref):
    bf16, f32 = jnp.bfloat16, jnp.float32
    adj = adj_ref[...]                                            # bf16, resident

    # layer 1: s1 = x @ W1 ; h1 = relu(adj @ s1 + b1)
    s1 = jnp.dot(x_ref[...], w1_ref[...], preferred_element_type=f32).astype(bf16)
    h1 = jnp.maximum(jnp.dot(adj, s1, preferred_element_type=f32) + b1_ref[...], 0.0)
    # dropout: identity at inference

    # layer 2
    s2 = jnp.dot(h1.astype(bf16), w2_ref[...], preferred_element_type=f32).astype(bf16)
    h2 = jnp.maximum(jnp.dot(adj, s2, preferred_element_type=f32) + b2_ref[...], 0.0)

    # layer 3 + log_softmax (padded class lanes masked via additive constant)
    s3 = jnp.dot(h2.astype(bf16), w3_ref[...], preferred_element_type=f32).astype(bf16)
    h3 = jnp.dot(adj, s3, preferred_element_type=f32) + b3_ref[...] + mask_ref[...]
    m = jnp.max(h3, axis=1, keepdims=True)
    z = h3 - m
    lse = jnp.log(jnp.sum(jnp.exp(z), axis=1, keepdims=True))
    out_ref[...] = (z - lse).astype(out_ref.dtype)


def _gcn_forward_fused(x, adj, params, budget):
    w1, b1, w2, b2, w3, b3 = params
    n, f = x.shape
    h_dim, c_dim = w1.shape[1], w3.shape[1]
    fp = _round_up(f, _LANE)
    hp = _round_up(h_dim, _LANE)
    cp = _round_up(c_dim, _LANE)
    n_pad = _round_up(max(n, _SUBLANE), _SUBLANE)

    bf16, f32 = jnp.bfloat16, jnp.float32
    x_p = _pad2d(x, n_pad, fp, bf16)
    adj_p = _pad2d(adj, n_pad, n_pad, bf16)
    w1p = _pad2d(w1, fp, hp, bf16)
    w2p = _pad2d(w2, hp, hp, bf16)
    w3p = _pad2d(w3, hp, cp, bf16)
    b1p = _pad2d(b1.reshape(1, -1), 1, hp, f32)
    b2p = _pad2d(b2.reshape(1, -1), 1, hp, f32)
    b3p = _pad2d(b3.reshape(1, -1), 1, cp, f32)
    maskp = jnp.where(jnp.arange(cp) < c_dim, 0.0, _NEG).astype(f32).reshape(1, cp)

    args = (x_p, adj_p, w1p, b1p, w2p, b2p, w3p, b3p, maskp)

    def whole(a):
        return pl.BlockSpec(a.shape, lambda i: (0, 0))

    out = pl.pallas_call(
        _fused_gcn_kernel,
        out_shape=jax.ShapeDtypeStruct((n_pad, cp), f32),
        grid_spec=pltpu.PrefetchScalarGridSpec(
            num_scalar_prefetch=0,
            grid=(1,),
            in_specs=[whole(a) for a in args],
            out_specs=pl.BlockSpec((n_pad, cp), lambda i: (0, 0))),
        compiler_params=pltpu.CompilerParams(
            dimension_semantics=("arbitrary",),
            vmem_limit_bytes=budget),
    )(*args)
    return out[:n, :c_dim]


# ----------------------------- tiled kernels (large N) ----------------------
# grid = (row_blocks, k_blocks); adj block (tm, tk), s block (tk, 128),
# f32 accumulator in scratch, epilogue under pl.when(k == last).


def _agg_relu_transform_kernel(adj_ref, s_ref, b_ref, w_next_ref, out_ref, acc_ref):
    k = pl.program_id(1)

    @pl.when(k == 0)
    def _():
        acc_ref[...] = jnp.zeros_like(acc_ref)

    acc_ref[...] += jnp.dot(adj_ref[...], s_ref[...],
                            preferred_element_type=jnp.float32)

    @pl.when(k == pl.num_programs(1) - 1)
    def _():
        h = jnp.maximum(acc_ref[...] + b_ref[...], 0.0)
        # dropout: identity at inference; next layer's row-local transform fused here
        out_ref[...] = jnp.dot(h.astype(jnp.bfloat16), w_next_ref[...],
                               preferred_element_type=jnp.float32).astype(out_ref.dtype)


def _agg_logsoftmax_kernel(adj_ref, s_ref, b_ref, mask_ref, out_ref, acc_ref):
    k = pl.program_id(1)

    @pl.when(k == 0)
    def _():
        acc_ref[...] = jnp.zeros_like(acc_ref)

    acc_ref[...] += jnp.dot(adj_ref[...], s_ref[...],
                            preferred_element_type=jnp.float32)

    @pl.when(k == pl.num_programs(1) - 1)
    def _():
        h = acc_ref[...] + b_ref[...] + mask_ref[...]
        m = jnp.max(h, axis=1, keepdims=True)
        z = h - m
        lse = jnp.log(jnp.sum(jnp.exp(z), axis=1, keepdims=True))
        out_ref[...] = (z - lse).astype(out_ref.dtype)


def _agg_call(kernel, adj_p, s, consts, out_cols, out_dtype, tm, tk, budget):
    n_pad = adj_p.shape[0]
    sp = s.shape[1]
    nb, kb = n_pad // tm, n_pad // tk
    in_specs = [pl.BlockSpec((tm, tk), lambda i, k: (i, k)),
                pl.BlockSpec((tk, sp), lambda i, k: (k, 0))]
    in_specs += [pl.BlockSpec(c.shape, lambda i, k: (0, 0)) for c in consts]
    return pl.pallas_call(
        kernel,
        out_shape=jax.ShapeDtypeStruct((n_pad, out_cols), out_dtype),
        grid_spec=pltpu.PrefetchScalarGridSpec(
            num_scalar_prefetch=0,
            grid=(nb, kb),
            in_specs=in_specs,
            out_specs=pl.BlockSpec((tm, out_cols), lambda i, k: (i, 0)),
            scratch_shapes=[pltpu.VMEM((tm, sp), jnp.float32)]),
        compiler_params=pltpu.CompilerParams(
            dimension_semantics=("parallel", "arbitrary"),
            vmem_limit_bytes=budget),
    )(adj_p, s, *consts)


def _gcn_forward_tiled(x, adj, params, budget, tile=None):
    w1, b1, w2, b2, w3, b3 = params
    n, f = x.shape
    h_dim, c_dim = w1.shape[1], w3.shape[1]
    hp = _round_up(h_dim, _LANE)
    cp = _round_up(c_dim, _LANE)

    if tile is None:
        # 512 on 128 MiB parts (v5e/v6e), 256 on v7x (fills the 2x256 MXU).
        tile = 512 if budget >= (72 << 20) else 256
    tm = tk = tile
    n_pad = _round_up(max(n, tm), tm)          # pad N -> always pipelined tiles

    bf16, f32 = jnp.bfloat16, jnp.float32
    adj_p = _pad2d(adj, n_pad, n_pad, bf16)
    x_p = _pad2d(x, n_pad, f, bf16)
    w1p = _pad2d(w1, f, hp, bf16)
    w2p = _pad2d(w2, hp, hp, bf16)
    w3p = _pad2d(w3, hp, cp, bf16)
    b1p = _pad2d(b1.reshape(1, -1), 1, hp, f32)
    b2p = _pad2d(b2.reshape(1, -1), 1, hp, f32)
    b3p = _pad2d(b3.reshape(1, -1), 1, cp, f32)
    maskp = jnp.where(jnp.arange(cp) < c_dim, 0.0, _NEG).astype(f32).reshape(1, cp)

    # Layer-1 feature transform is a tiny GEMM: let XLA do it (no extra
    # Pallas launch, no HBM round trip of s1 through a second kernel).
    s1 = jnp.dot(x_p, w1p, preferred_element_type=f32).astype(bf16)

    s2 = _agg_call(_agg_relu_transform_kernel, adj_p, s1, (b1p, w2p),
                   hp, bf16, tm, tk, budget)
    s3 = _agg_call(_agg_relu_transform_kernel, adj_p, s2, (b2p, w3p),
                   cp, bf16, tm, tk, budget)
    outp = _agg_call(_agg_logsoftmax_kernel, adj_p, s3, (b3p, maskp),
                     cp, f32, tm, tk, budget)
    return outp[:n, :c_dim]


# ----------------------------- dispatcher ------------------------------------


def gcn_forward(x, adj, params):
    budget = _vmem_budget_bytes()
    n = x.shape[0]
    n8 = _round_up(max(n, _SUBLANE), _SUBLANE)
    # fused footprint: double-buffered bf16 adj + per-row temps/out + slack
    fused_bytes = 4 * n8 * n8 + 6 * 1024 * n8 + (2 << 20)
    if fused_bytes <= (budget * 2) // 3:
        return _gcn_forward_fused(x, adj, params, budget)
    return _gcn_forward_tiled(x, adj, params, budget)


# ----------------------------- reference / init ------------------------------


def init_gc_params(key, fan_in, fan_out):
    # matches pygcn GraphConvolution.reset_parameters: uniform(-stdv, stdv)
    stdv = 1.0 / jnp.sqrt(jnp.float32(fan_out))
    kw, kb = jax.random.split(key)
    w = jax.random.uniform(kw, (fan_in, fan_out), jnp.float32, -stdv, stdv)
    b = jax.random.uniform(kb, (1, fan_out), jnp.float32, -stdv, stdv)
    return w, b


def reference_forward_f32(x, adj, params):
    w1, b1, w2, b2, w3, b3 = params
    h = jnp.maximum(adj @ (x @ w1) + b1, 0.0)
    h = jnp.maximum(adj @ (h @ w2) + b2, 0.0)
    h = adj @ (h @ w3) + b3
    return jax.nn.log_softmax(h, axis=1)


def reference_forward_bf16(x, adj, params):
    # Mimics the kernel's cast points (bf16 MXU operands, f32 accumulation).
    w1, b1, w2, b2, w3, b3 = params
    bf, f32 = jnp.bfloat16, jnp.float32
    xb, ab = x.astype(bf), adj.astype(bf)
    s1 = jnp.dot(xb, w1.astype(bf), preferred_element_type=f32).astype(bf)
    h1 = jnp.maximum(jnp.dot(ab, s1, preferred_element_type=f32) + b1, 0.0)
    s2 = jnp.dot(h1.astype(bf), w2.astype(bf), preferred_element_type=f32).astype(bf)
    h2 = jnp.maximum(jnp.dot(ab, s2, preferred_element_type=f32) + b2, 0.0)
    s3 = jnp.dot(h2.astype(bf), w3.astype(bf), preferred_element_type=f32).astype(bf)
    h3 = jnp.dot(ab, s3, preferred_element_type=f32) + b3
    return jax.nn.log_softmax(h3, axis=1)


if __name__ == "__main__":
    NFEAT, NHID, NCLASS = 64, 32, 8

    def make_inputs(key, n):
        kx, kadj = jax.random.split(key)
        xx = jax.random.normal(kx, (n, NFEAT), jnp.float32)
        a = (jax.random.uniform(kadj, (n, n)) < 0.05).astype(jnp.float32)
        a = jnp.maximum(a, a.T) + jnp.eye(n, dtype=jnp.float32)
        d_inv_sqrt = 1.0 / jnp.sqrt(jnp.sum(a, axis=1))
        aa = a * d_inv_sqrt[:, None] * d_inv_sqrt[None, :]
        return xx, aa

    key = jax.random.PRNGKey(0)
    kin1, kin2, k1, k2, k3 = jax.random.split(key, 5)
    w1, b1 = init_gc_params(k1, NFEAT, NHID)
    w2, b2 = init_gc_params(k2, NHID, NHID)
    w3, b3 = init_gc_params(k3, NHID, NCLASS)
    params = (w1, b1, w2, b2, w3, b3)

    # --- small graph (N=128): fused single-launch, VMEM-resident path --------
    x, adj = make_inputs(kin1, 128)
    out = jax.block_until_ready(jax.jit(gcn_forward)(x, adj, params))
    assert out.shape == (128, NCLASS)
    ref_b = reference_forward_bf16(x, adj, params)
    ref_f = reference_forward_f32(x, adj, params)
    assert jnp.allclose(out, ref_b, atol=1e-2, rtol=1e-2), (
        "fused vs bf16 ref, max abs diff = "
        + str(float(jnp.max(jnp.abs(out - ref_b)))))
    assert jnp.allclose(out, ref_f, atol=1.5e-1, rtol=1e-1), (
        "fused vs f32 ref, max abs diff = "
        + str(float(jnp.max(jnp.abs(out - ref_f)))))

    # --- non-divisible N: exercise the K-tiled streaming path (tile=128) -----
    x2, adj2 = make_inputs(kin2, 320)
    tiled_fn = jax.jit(lambda xa, aa, pp: _gcn_forward_tiled(
        xa, aa, pp, _vmem_budget_bytes(), tile=128))
    out2 = jax.block_until_ready(tiled_fn(x2, adj2, params))
    assert out2.shape == (320, NCLASS)
    ref2_b = reference_forward_bf16(x2, adj2, params)
    ref2_f = reference_forward_f32(x2, adj2, params)
    assert jnp.allclose(out2, ref2_b, atol=2e-2, rtol=2e-2), (
        "tiled vs bf16 ref, max abs diff = "
        + str(float(jnp.max(jnp.abs(out2 - ref2_b)))))
    assert jnp.allclose(out2, ref2_f, atol=2.5e-1, rtol=1e-1), (
        "tiled vs f32 ref, max abs diff = "
        + str(float(jnp.max(jnp.abs(out2 - ref2_f)))))

    print("KERNEL_OK")
</pallas_src>

<mosaic_0001>
module attributes {stable_mosaic.version = 11 : i64} {
  func.func @_fused_gcn_kernel(%arg0: i32, %arg1: memref<128x128xbf16, #tpu.memory_space<vmem>>, %arg2: memref<128x128xbf16, #tpu.memory_space<vmem>>, %arg3: memref<128x128xbf16, #tpu.memory_space<vmem>>, %arg4: memref<1x128xf32, #tpu.memory_space<vmem>>, %arg5: memref<128x128xbf16, #tpu.memory_space<vmem>>, %arg6: memref<1x128xf32, #tpu.memory_space<vmem>>, %arg7: memref<128x128xbf16, #tpu.memory_space<vmem>>, %arg8: memref<1x128xf32, #tpu.memory_space<vmem>>, %arg9: memref<1x128xf32, #tpu.memory_space<vmem>>, %arg10: memref<128x128xf32, #tpu.memory_space<vmem>>) attributes {dimension_semantics = [#tpu.dimension_semantics<arbitrary>], iteration_bounds = array<i64: 1>, scalar_prefetch = 0 : i64, scratch_operands = 0 : i64, tpu.core_type = #tpu.core_type<tc>, window_params = [{pipeline_mode = #tpu.pipeline_mode<synchronous>, transform_indices = @transform_0, window_bounds = array<i64: 128, 128>}, {pipeline_mode = #tpu.pipeline_mode<synchronous>, transform_indices = @transform_1, window_bounds = array<i64: 128, 128>}, {pipeline_mode = #tpu.pipeline_mode<synchronous>, transform_indices = @transform_2, window_bounds = array<i64: 128, 128>}, {pipeline_mode = #tpu.pipeline_mode<synchronous>, transform_indices = @transform_3, window_bounds = array<i64: 1, 128>}, {pipeline_mode = #tpu.pipeline_mode<synchronous>, transform_indices = @transform_4, window_bounds = array<i64: 128, 128>}, {pipeline_mode = #tpu.pipeline_mode<synchronous>, transform_indices = @transform_5, window_bounds = array<i64: 1, 128>}, {pipeline_mode = #tpu.pipeline_mode<synchronous>, transform_indices = @transform_6, window_bounds = array<i64: 128, 128>}, {pipeline_mode = #tpu.pipeline_mode<synchronous>, transform_indices = @transform_7, window_bounds = array<i64: 1, 128>}, {pipeline_mode = #tpu.pipeline_mode<synchronous>, transform_indices = @transform_8, window_bounds = array<i64: 1, 128>}, {pipeline_mode = #tpu.pipeline_mode<synchronous>, transform_indices = @transform_9, window_bounds = array<i64: 128, 128>}]} {
    %c0 = arith.constant 0 : index
    %c0_0 = arith.constant 0 : index
    %0 = vector.load %arg2[%c0, %c0_0] : memref<128x128xbf16, #tpu.memory_space<vmem>>, vector<128x128xbf16>
    %c0_1 = arith.constant 0 : index
    %c0_2 = arith.constant 0 : index
    %1 = vector.load %arg1[%c0_1, %c0_2] : memref<128x128xbf16, #tpu.memory_space<vmem>>, vector<128x128xbf16>
    %c0_3 = arith.constant 0 : index
    %c0_4 = arith.constant 0 : index
    %2 = vector.load %arg3[%c0_3, %c0_4] : memref<128x128xbf16, #tpu.memory_space<vmem>>, vector<128x128xbf16>
    %cst = arith.constant dense<0.000000e+00> : vector<128x128xf32>
    %3 = tpu.matmul %1, %2, %cst {dimension_numbers = #tpu.dot_dimension_numbers<[1], [0], [0], [1], [0, 0, 1, 1], [], []>} : vector<128x128xbf16>, vector<128x128xbf16>, vector<128x128xf32> -> vector<128x128xf32>
    %4 = arith.truncf %3 : vector<128x128xf32> to vector<128x128xbf16>
    %cst_5 = arith.constant dense<0.000000e+00> : vector<128x128xf32>
    %5 = tpu.matmul %0, %4, %cst_5 {dimension_numbers = #tpu.dot_dimension_numbers<[1], [0], [0], [1], [0, 0, 1, 1], [], []>} : vector<128x128xbf16>, vector<128x128xbf16>, vector<128x128xf32> -> vector<128x128xf32>
    %c0_6 = arith.constant 0 : index
    %c0_7 = arith.constant 0 : index
    %6 = vector.load %arg4[%c0_6, %c0_7] : memref<1x128xf32, #tpu.memory_space<vmem>>, vector<1x128xf32>
    %7 = vector.broadcast %6 : vector<1x128xf32> to vector<128x128xf32>
    %8 = arith.addf %5, %7 : vector<128x128xf32>
    %cst_8 = arith.constant 0.000000e+00 : f32
    %9 = vector.broadcast %cst_8 : f32 to vector<128x128xf32>
    %10 = arith.maximumf %8, %9 : vector<128x128xf32>
    %11 = arith.truncf %10 : vector<128x128xf32> to vector<128x128xbf16>
    %c0_9 = arith.constant 0 : index
    %c0_10 = arith.constant 0 : index
    %12 = vector.load %arg5[%c0_9, %c0_10] : memref<128x128xbf16, #tpu.memory_space<vmem>>, vector<128x128xbf16>
    %cst_11 = arith.constant dense<0.000000e+00> : vector<128x128xf32>
    %13 = tpu.matmul %11, %12, %cst_11 {dimension_numbers = #tpu.dot_dimension_numbers<[1], [0], [0], [1], [0, 0, 1, 1], [], []>} : vector<128x128xbf16>, vector<128x128xbf16>, vector<128x128xf32> -> vector<128x128xf32>
    %14 = arith.truncf %13 : vector<128x128xf32> to vector<128x128xbf16>
    %cst_12 = arith.constant dense<0.000000e+00> : vector<128x128xf32>
    %15 = tpu.matmul %0, %14, %cst_12 {dimension_numbers = #tpu.dot_dimension_numbers<[1], [0], [0], [1], [0, 0, 1, 1], [], []>} : vector<128x128xbf16>, vector<128x128xbf16>, vector<128x128xf32> -> vector<128x128xf32>
    %c0_13 = arith.constant 0 : index
    %c0_14 = arith.constant 0 : index
    %16 = vector.load %arg6[%c0_13, %c0_14] : memref<1x128xf32, #tpu.memory_space<vmem>>, vector<1x128xf32>
    %17 = vector.broadcast %16 : vector<1x128xf32> to vector<128x128xf32>
    %18 = arith.addf %15, %17 : vector<128x128xf32>
    %cst_15 = arith.constant 0.000000e+00 : f32
    %19 = vector.broadcast %cst_15 : f32 to vector<128x128xf32>
    %20 = arith.maximumf %18, %19 : vector<128x128xf32>
    %21 = arith.truncf %20 : vector<128x128xf32> to vector<128x128xbf16>
    %c0_16 = arith.constant 0 : index
    %c0_17 = arith.constant 0 : index
    %22 = vector.load %arg7[%c0_16, %c0_17] : memref<128x128xbf16, #tpu.memory_space<vmem>>, vector<128x128xbf16>
    %cst_18 = arith.constant dense<0.000000e+00> : vector<128x128xf32>
    %23 = tpu.matmul %21, %22, %cst_18 {dimension_numbers = #tpu.dot_dimension_numbers<[1], [0], [0], [1], [0, 0, 1, 1], [], []>} : vector<128x128xbf16>, vector<128x128xbf16>, vector<128x128xf32> -> vector<128x128xf32>
    %24 = arith.truncf %23 : vector<128x128xf32> to vector<128x128xbf16>
    %cst_19 = arith.constant dense<0.000000e+00> : vector<128x128xf32>
    %25 = tpu.matmul %0, %24, %cst_19 {dimension_numbers = #tpu.dot_dimension_numbers<[1], [0], [0], [1], [0, 0, 1, 1], [], []>} : vector<128x128xbf16>, vector<128x128xbf16>, vector<128x128xf32> -> vector<128x128xf32>
    %c0_20 = arith.constant 0 : index
    %c0_21 = arith.constant 0 : index
    %26 = vector.load %arg8[%c0_20, %c0_21] : memref<1x128xf32, #tpu.memory_space<vmem>>, vector<1x128xf32>
    %27 = vector.broadcast %26 : vector<1x128xf32> to vector<128x128xf32>
    %28 = arith.addf %25, %27 : vector<128x128xf32>
    %c0_22 = arith.constant 0 : index
    %c0_23 = arith.constant 0 : index
    %29 = vector.load %arg9[%c0_22, %c0_23] : memref<1x128xf32, #tpu.memory_space<vmem>>, vector<1x128xf32>
    %30 = vector.broadcast %29 : vector<1x128xf32> to vector<128x128xf32>
    %31 = arith.addf %28, %30 : vector<128x128xf32>
    %cst_24 = arith.constant dense<0xFF800000> : vector<128xf32>
    %32 = vector.multi_reduction <maximumf>, %31, %cst_24 [1] : vector<128x128xf32> to vector<128xf32>
    %33 = vector.shape_cast %32 : vector<128xf32> to vector<128x1xf32>
    %34 = vector.broadcast %33 : vector<128x1xf32> to vector<128x128xf32>
    %35 = arith.subf %31, %34 : vector<128x128xf32>
    %36 = math.exp %35 : vector<128x128xf32>
    %cst_25 = arith.constant dense<0.000000e+00> : vector<128xf32>
    %37 = vector.multi_reduction <add>, %36, %cst_25 [1] : vector<128x128xf32> to vector<128xf32>
    %38 = vector.shape_cast %37 : vector<128xf32> to vector<128x1xf32>
    %39 = math.log %38 : vector<128x1xf32>
    %40 = vector.broadcast %39 : vector<128x1xf32> to vector<128x128xf32>
    %41 = arith.subf %35, %40 : vector<128x128xf32>
    %c0_26 = arith.constant 0 : index
    %c0_27 = arith.constant 0 : index
    %42 = vector.load %arg10[%c0_26, %c0_27] : memref<128x128xf32, #tpu.memory_space<vmem>>, vector<128x128xf32>
    tpu.vector_store %arg10[%c0_26, %c0_27], %41 {strides = array<i32>} : memref<128x128xf32, #tpu.memory_space<vmem>>, vector<128x128xf32>,
    return
  }
  func.func @transform_0(%arg0: i32) -> (i32, i32) {
    %c0_i32 = arith.constant 0 : i32
    %c0_i32_0 = arith.constant 0 : i32
    %c0_i32_1 = arith.constant 0 : i32
    return %c0_i32, %c0_i32_0 : i32, i32
  }
  func.func @transform_1(%arg0: i32) -> (i32, i32) {
    %c0_i32 = arith.constant 0 : i32
    %c0_i32_0 = arith.constant 0 : i32
    %c0_i32_1 = arith.constant 0 : i32
    return %c0_i32, %c0_i32_0 : i32, i32
  }
  func.func @transform_2(%arg0: i32) -> (i32, i32) {
    %c0_i32 = arith.constant 0 : i32
    %c0_i32_0 = arith.constant 0 : i32
    %c0_i32_1 = arith.constant 0 : i32
    return %c0_i32, %c0_i32_0 : i32, i32
  }
  func.func @transform_3(%arg0: i32) -> (i32, i32) {
    %c0_i32 = arith.constant 0 : i32
    %c0_i32_0 = arith.constant 0 : i32
    %c0_i32_1 = arith.constant 0 : i32
    return %c0_i32, %c0_i32_0 : i32, i32
  }
  func.func @transform_4(%arg0: i32) -> (i32, i32) {
    %c0_i32 = arith.constant 0 : i32
    %c0_i32_0 = arith.constant 0 : i32
    %c0_i32_1 = arith.constant 0 : i32
    return %c0_i32, %c0_i32_0 : i32, i32
  }
  func.func @transform_5(%arg0: i32) -> (i32, i32) {
    %c0_i32 = arith.constant 0 : i32
    %c0_i32_0 = arith.constant 0 : i32
    %c0_i32_1 = arith.constant 0 : i32
    return %c0_i32, %c0_i32_0 : i32, i32
  }
  func.func @transform_6(%arg0: i32) -> (i32, i32) {
    %c0_i32 = arith.constant 0 : i32
    %c0_i32_0 = arith.constant 0 : i32
    %c0_i32_1 = arith.constant 0 : i32
    return %c0_i32, %c0_i32_0 : i32, i32
  }
  func.func @transform_7(%arg0: i32) -> (i32, i32) {
    %c0_i32 = arith.constant 0 : i32
    %c0_i32_0 = arith.constant 0 : i32
    %c0_i32_1 = arith.constant 0 : i32
    return %c0_i32, %c0_i32_0 : i32, i32
  }
  func.func @transform_8(%arg0: i32) -> (i32, i32) {
    %c0_i32 = arith.constant 0 : i32
    %c0_i32_0 = arith.constant 0 : i32
    %c0_i32_1 = arith.constant 0 : i32
    return %c0_i32, %c0_i32_0 : i32, i32
  }
  func.func @transform_9(%arg0: i32) -> (i32, i32) {
    %c0_i32 = arith.constant 0 : i32
    %c0_i32_0 = arith.constant 0 : i32
    %c0_i32_1 = arith.constant 0 : i32
    return %c0_i32, %c0_i32_0 : i32, i32
  }
}

</mosaic_0001>

<bundles_post_ra>
// kernel: gcn_forward.1
= control target key start
LH: loop header
LB: loop body
LE: loop exit
PB: predicated region body
PF: predicated region fallthrough
CT: control target
= control target key end

     0   :  { %s2025_s2 = inlined_call_operand.vmem [shape: bf16[128,128], index: 2, kind: input, shape index: {}]   ;;  %s2026_s0 = inlined_call_operand.vmem [shape: bf16[128,128], index: 0, kind: input, shape index: {}]   ;;  %s2027_s1 = inlined_call_operand.vmem [shape: bf16[128,128], index: 1, kind: input, shape index: {}]   ;;  %s2028_s4 = inlined_call_operand.vmem [shape: bf16[128,128], index: 4, kind: input, shape index: {}]   ;;  %s2029_s3 = inlined_call_operand.vmem [shape: f32[1,128], index: 3, kind: input, shape index: {}]   ;;  %s2030_s6 = inlined_call_operand.vmem [shape: bf16[128,128], index: 6, kind: input, shape index: {}]   ;;  %s2031_s5 = inlined_call_operand.vmem [shape: f32[1,128], index: 5, kind: input, shape index: {}]   ;;  %s2032_s7 = inlined_call_operand.vmem [shape: f32[1,128], index: 7, kind: input, shape index: {}]   ;;  %s2033_s8 = inlined_call_operand.vmem [shape: f32[1,128], index: 8, kind: input, shape index: {}]   ;;  %s2034_s9 = inlined_call_operand.vmem [shape: f32[128,128], index: 9, kind: output, shape index: {}]  }
   0x1   :  { %v1563_v0 = vld [vmem:[%s2025_s2] sm:$0xff]   ;;  %v1564_v1 = vld [vmem:[%s2025_s2 + $0x8] sm:$0xff]   ;;  %v1565_v2 = vld [vmem:[%s2025_s2 + $0x10] sm:$0xff]  }
   0x2   :  { %1371 = vmatprep.subr.bf16.mxu0 %v1563_v0  ;;  %v1566_v3 = vld [vmem:[%s2025_s2 + $0x18] sm:$0xff]   ;;  %v1571_v4 = vld [vmem:[%s2026_s0] sm:$0xff]   ;;  %v1568_v6 = vld [vmem:[%s2025_s2 + $0x28] sm:$0xff]  }
   0x3   :  { %1372 = vmatpush3.bf16.msra.mxu0 %v1563_v0  ;;  %1387 = vmatprep.mubr.bf16.mxu0 %v1571_v4  ;;  %v1567_v5 = vld [vmem:[%s2025_s2 + $0x20] sm:$0xff]   ;;  %v1569_v7 = vld [vmem:[%s2025_s2 + $0x30] sm:$0xff]   ;;  %v1570_v8 = vld [vmem:[%s2025_s2 + $0x38] sm:$0xff]  }
   0x4   :  { %1373 = vmatprep.subr.bf16.mxu0 %v1564_v1  ;;  %v1572_v9 = vld [vmem:[%s2026_s0 + $0x8] sm:$0xff]   ;;  %v1573_v10 = vld [vmem:[%s2026_s0 + $0x10] sm:$0xff]   ;;  %v1574_v11 = vld [vmem:[%s2026_s0 + $0x18] sm:$0xff]  }
   0x5   :  { %v1575_v12 = vld [vmem:[%s2026_s0 + $0x20] sm:$0xff]   ;;  %v1576_v13 = vld [vmem:[%s2026_s0 + $0x28] sm:$0xff]   ;;  %v1577_v14 = vld [vmem:[%s2026_s0 + $0x30] sm:$0xff]  }
   0x6   :  { %v1578_v15 = vld [vmem:[%s2026_s0 + $0x38] sm:$0xff]   ;;  %v1768_v16 = vld [vmem:[%s2027_s1] sm:$0xff]   ;;  %v1588_v18 = vld [vmem:[%s2028_s4 + $0x8] sm:$0xff]  }
   0x7   :  { %1374 = vmatpush3.bf16.msra.mxu0 %v1564_v1  ;;  %1419 = vmatprep.mubr.bf16.mxu1 %v1768_v16  ;;  %v1587_v17 = vld [vmem:[%s2028_s4] sm:$0xff]   ;;  %v1589_v19 = vld [vmem:[%s2028_s4 + $0x10] sm:$0xff]   ;;  %v1590_v20 = vld [vmem:[%s2028_s4 + $0x18] sm:$0xff]  }
   0x8   :  { %1375 = vmatprep.subr.bf16.mxu0 %v1565_v2  ;;  %v1591_v21 = vld [vmem:[%s2028_s4 + $0x20] sm:$0xff]   ;;  %v1592_v22 = vld [vmem:[%s2028_s4 + $0x28] sm:$0xff]   ;;  %v1797_v48 = vld [vmem:[%s2027_s1 + $0x10] sm:$0xff]  }
   0x9   :  { %v1792_v47 = vld [vmem:[%s2027_s1 + $0x8] sm:$0xff]   ;;  %v1804_v49 = vld [vmem:[%s2027_s1 + $0x18] sm:$0xff]   ;;  %v1809_v50 = vld [vmem:[%s2027_s1 + $0x20] sm:$0xff]  }
   0xa   :  { %v1816_v51 = vld [vmem:[%s2027_s1 + $0x28] sm:$0xff]   ;;  %v1821_v52 = vld [vmem:[%s2027_s1 + $0x30] sm:$0xff]   ;;  %v1828_v53 = vld [vmem:[%s2027_s1 + $0x38] sm:$0xff]  }
   0xb   :  { %1376 = vmatpush3.bf16.msra.mxu0 %v1565_v2  ;;  %v1593_v54 = vld [vmem:[%s2028_s4 + $0x30] sm:$0xff]   ;;  %v1594_v55 = vld [vmem:[%s2028_s4 + $0x38] sm:$0xff]   ;;  %v1247_v56 = vld [vmem:[%s2029_s3] ss:$0 sm:$0xff] }
   0xc   :  { %1377 = vmatprep.subr.bf16.mxu0 %v1566_v3 }
   0xf   :  { %1378 = vmatpush3.bf16.msra.mxu0 %v1566_v3 }
  0x10   :  { %1379 = vmatprep.subr.bf16.mxu0 %v1567_v5 }
  0x13   :  { %1380 = vmatpush3.bf16.msra.mxu0 %v1567_v5 }
  0x14   :  { %1381 = vmatprep.subr.bf16.mxu0 %v1568_v6 }
  0x17   :  { %1382 = vmatpush3.bf16.msra.mxu0 %v1568_v6 }
  0x18   :  { %1383 = vmatprep.subr.bf16.mxu0 %v1569_v7 }
  0x1b   :  { %1384 = vmatpush3.bf16.msra.mxu0 %v1569_v7 }
  0x1c   :  { %1385 = vmatprep.subr.bf16.mxu0 %v1570_v8 }
  0x1f   :  { %1386 = vmatpush3.bf16.msra.mxu0 %v1570_v8 }
  0x20   :  { %1435 = vmatprep.subr.bf16.mxu0 %v1587_v17 }
  0x22   :  { %1388 = vmatmul.mubr.bf16.vlgmr.msra.gmra.mrb[0].mxu0 %v1572_v9 }
  0x23   :  { %1391 = vmatprep.mubr.bf16.mxu0 %v1573_v10  ;;  %1436 = vmatpush3.bf16.msra.mxu0 %v1587_v17 }
  0x24   :  { %1437 = vmatprep.subr.bf16.mxu0 %v1588_v18 }
  0x27   :  { %1438 = vmatpush3.bf16.msra.mxu0 %v1588_v18 }
  0x28   :  { %1439 = vmatprep.subr.bf16.mxu0 %v1589_v19 }
  0x2a   :  { %1392 = vmatmul.mubr.bf16.gmra.mrb[4].mxu0 %v1574_v11 }
  0x2b   :  { %1395 = vmatprep.mubr.bf16.mxu0 %v1575_v12  ;;  %1440 = vmatpush3.bf16.msra.mxu0 %v1589_v19 }
  0x2c   :  { %1441 = vmatprep.subr.bf16.mxu0 %v1590_v20 }
  0x2f   :  { %1442 = vmatpush3.bf16.msra.mxu0 %v1590_v20 }
  0x30   :  { %1443 = vmatprep.subr.bf16.mxu0 %v1591_v21 }
  0x32   :  { %1396 = vmatmul.mubr.bf16.gmra.mrb[8].mxu0 %v1576_v13 }
  0x33   :  { %1399 = vmatprep.mubr.bf16.mxu0 %v1577_v14  ;;  %1444 = vmatpush3.bf16.msra.mxu0 %v1591_v21 }
  0x34   :  { %1445 = vmatprep.subr.bf16.mxu0 %v1592_v22 }
  0x37   :  { %1446 = vmatpush3.bf16.msra.mxu0 %v1592_v22 }
  0x38   :  { %1447 = vmatprep.subr.bf16.mxu0 %v1593_v54 }
  0x3a   :  { %1400 = vmatmul.mubr.bf16.gmra.mrb[12].mxu0 %v1578_v15 }
  0x3b   :  { %1448 = vmatpush3.bf16.msra.mxu0 %v1593_v54 }
  0x3c   :  { %1449 = vmatprep.subr.bf16.mxu0 %v1594_v55 }
  0x3f   :  { %1450 = vmatpush3.bf16.msra.mxu0 %v1594_v55 }
  0xf5   :  { %v1389_v23 = vpop.f32.mrb[0].mxu0 }
  0xf6   :  { %v211_v24 = vpop.f32.mrb[1].mxu0 }
  0xf7   :  { %v1390_v25 = vpop.f32.mrb[2].mxu0 }
  0xf8   :  { %v275_v26 = vpack.c.bf16 %v1390_v25, %v1389_v23  ;;  %v214_v27 = vpop.f32.mrb[3].mxu0 }
  0xf9   :  { %v274_v28 = vpack.c.bf16 %v214_v27, %v211_v24 }
  0xfb   :  { %1403 = vmatprep.subr.bf16.mxu1 %v274_v28 }
  0xfc   :  { %1404 = vmatpush3.bf16.msra.mxu1 %v274_v28 }
  0xfd   :  { %v1393_v29 = vpop.f32.mrb[4].mxu0  ;;  %1405 = vmatprep.subr.bf16.mxu1 %v275_v26 }
  0xfe   :  { %v227_v30 = vpop.f32.mrb[5].mxu0 }
  0xff   :  { %v1394_v31 = vpop.f32.mrb[6].mxu0 }
 0x100   :  { %v277_v32 = vpack.c.bf16 %v1394_v31, %v1393_v29  ;;  %v230_v33 = vpop.f32.mrb[7].mxu0  ;;  %1406 = vmatpush3.bf16.msra.mxu1 %v275_v26 }
 0x101   :  { %v276_v34 = vpack.c.bf16 %v230_v33, %v227_v30 }
 0x103   :  { %1407 = vmatprep.subr.bf16.mxu1 %v276_v34 }
 0x104   :  { %1408 = vmatpush3.bf16.msra.mxu1 %v276_v34 }
 0x105   :  { %v1397_v35 = vpop.f32.mrb[8].mxu0  ;;  %1409 = vmatprep.subr.bf16.mxu1 %v277_v32 }
 0x106   :  { %v243_v36 = vpop.f32.mrb[9].mxu0 }
 0x107   :  { %v1398_v37 = vpop.f32.mrb[10].mxu0 }
 0x108   :  { %v279_v38 = vpack.c.bf16 %v1398_v37, %v1397_v35  ;;  %v246_v39 = vpop.f32.mrb[11].mxu0  ;;  %1410 = vmatpush3.bf16.msra.mxu1 %v277_v32 }
 0x109   :  { %v278_v40 = vpack.c.bf16 %v246_v39, %v243_v36 }
 0x10b   :  { %1411 = vmatprep.subr.bf16.mxu1 %v278_v40 }
 0x10c   :  { %1412 = vmatpush3.bf16.msra.mxu1 %v278_v40 }
 0x10d   :  { %v1401_v41 = vpop.f32.mrb[12].mxu0  ;;  %1413 = vmatprep.subr.bf16.mxu1 %v279_v38 }
 0x10e   :  { %v259_v42 = vpop.f32.mrb[13].mxu0 }
 0x10f   :  { %v1402_v43 = vpop.f32.mrb[14].mxu0 }
 0x110   :  { %v281_v44 = vpack.c.bf16 %v1402_v43, %v1401_v41  ;;  %v262_v45 = vpop.f32.mrb[15].mxu0  ;;  %1414 = vmatpush3.bf16.msra.mxu1 %v279_v38 }
 0x111   :  { %v280_v46 = vpack.c.bf16 %v262_v45, %v259_v42 }
 0x113   :  { %1415 = vmatprep.subr.bf16.mxu1 %v280_v46 }
 0x114   :  { %1416 = vmatpush3.bf16.msra.mxu1 %v280_v46 }
 0x115   :  { %1417 = vmatprep.subr.bf16.mxu1 %v281_v44 }
 0x118   :  { %1418 = vmatpush3.bf16.msra.mxu1 %v281_v44 }
 0x11b   :  { %1420 = vmatmul.mubr.bf16.vlgmr.msra.gmra.mrb[0].mxu1 %v1792_v47 }
 0x11c   :  { %1423 = vmatprep.mubr.bf16.mxu1 %v1797_v48 }
 0x123   :  { %1424 = vmatmul.mubr.bf16.gmra.mrb[4].mxu1 %v1804_v49 }
 0x124   :  { %1427 = vmatprep.mubr.bf16.mxu1 %v1809_v50 }
 0x12b   :  { %1428 = vmatmul.mubr.bf16.gmra.mrb[8].mxu1 %v1816_v51 }
 0x12c   :  { %1431 = vmatprep.mubr.bf16.mxu1 %v1821_v52 }
 0x133   :  { %1432 = vmatmul.mubr.bf16.gmra.mrb[12].mxu1 %v1828_v53 }
 0x134   :  { %1483 = vmatprep.mubr.bf16.mxu1 %v1768_v16 }
 0x1ee   :  { %v1421_v57 = vpop.f32.mrb[0].mxu1 }
 0x1ef   :  { %v380_v58 = vadd.f32 %v1421_v57, %v1247_v56  ;;  %v371_v59 = vpop.f32.mrb[1].mxu1 }
 0x1f0   :  { %v372_v60 = vadd.f32 %v1247_v56, %v371_v59  ;;  %v1422_v61 = vpop.f32.mrb[2].mxu1  ;;  %v1596_v59 = vld [vmem:[%s2030_s6 + $0x8] sm:$0xff]  }
 0x1f1   :  { %v383_v62 = vadd.f32 %v1422_v61, %v1247_v56  ;;  %v374_v63 = vpop.f32.mrb[3].mxu1  ;;  %v436_v1 = vmax.f32 %v380_v58, 0.0  ;;  %v1595_v58 = vld [vmem:[%s2030_s6] sm:$0xff]  }
 0x1f2   :  { %v375_v0 = vadd.f32 %v1247_v56, %v374_v63  ;;  %v434_v3 = vmax.f32 %v372_v60, 0.0  ;;  %1499 = vmatprep.subr.bf16.mxu0 %v1595_v58  ;;  %v1598_v60 = vld [vmem:[%s2030_s6 + $0x18] sm:$0xff]   ;;  %v1599_v61 = vld [vmem:[%s2030_s6 + $0x20] sm:$0xff]  }
 0x1f3   :  { %v437_v2 = vmax.f32 %v383_v62, 0.0  ;;  %v1600_v62 = vld [vmem:[%s2030_s6 + $0x28] sm:$0xff]  }
 0x1f4   :  { %v435_v4 = vmax.f32 %v375_v0, 0.0 }
 0x1f5   :  { %v451_v5 = vpack.c.bf16 %v437_v2, %v436_v1 }
 0x1f6   :  { %v450_v6 = vpack.c.bf16 %v435_v4, %v434_v3  ;;  %v1425_v7 = vpop.f32.mrb[4].mxu1 }
 0x1f7   :  { %v396_v8 = vadd.f32 %v1425_v7, %v1247_v56  ;;  %v387_v9 = vpop.f32.mrb[5].mxu1 }
 0x1f8   :  { %v388_v10 = vadd.f32 %v1247_v56, %v387_v9  ;;  %v1426_v11 = vpop.f32.mrb[6].mxu1  ;;  %1451 = vmatprep.mubr.bf16.mxu0 %v450_v6 }
 0x1f9   :  { %v399_v12 = vadd.f32 %v1426_v11, %v1247_v56  ;;  %v390_v13 = vpop.f32.mrb[7].mxu1  ;;  %1452 = vmatmul.mubr.bf16.vlgmr.msra.gmra.mrb[16].mxu0 %v451_v5  ;;  %v440_v15 = vmax.f32 %v396_v8, 0.0 }
 0x1fa   :  { %v391_v14 = vadd.f32 %v1247_v56, %v390_v13  ;;  %v438_v18 = vmax.f32 %v388_v10, 0.0  ;;  %1500 = vmatpush3.bf16.msra.mxu0 %v1595_v58 }
 0x1fb   :  { %v441_v17 = vmax.f32 %v399_v12, 0.0  ;;  %1501 = vmatprep.subr.bf16.mxu0 %v1596_v59 }
 0x1fc   :  { %v439_v19 = vmax.f32 %v391_v14, 0.0 }
 0x1fd   :  { %v453_v20 = vpack.c.bf16 %v441_v17, %v440_v15 }
 0x1fe   :  { %v452_v21 = vpack.c.bf16 %v439_v19, %v438_v18  ;;  %v1429_v22 = vpop.f32.mrb[8].mxu1  ;;  %1502 = vmatpush3.bf16.msra.mxu0 %v1596_v59 }
 0x1ff   :  { %v412_v23 = vadd.f32 %v1429_v22, %v1247_v56  ;;  %v403_v24 = vpop.f32.mrb[9].mxu1 }
 0x200   :  { %v404_v25 = vadd.f32 %v1247_v56, %v403_v24  ;;  %v1430_v26 = vpop.f32.mrb[10].mxu1  ;;  %1455 = vmatprep.mubr.bf16.mxu0 %v452_v21  ;;  %v1601_v24 = vld [vmem:[%s2030_s6 + $0x30] sm:$0xff]  }
 0x201   :  { %v415_v27 = vadd.f32 %v1430_v26, %v1247_v56  ;;  %v406_v28 = vpop.f32.mrb[11].mxu1  ;;  %1456 = vmatmul.mubr.bf16.gmra.mrb[20].mxu0 %v453_v20  ;;  %v444_v30 = vmax.f32 %v412_v23, 0.0  ;;  %v1264_v26 = vld [vmem:[%s2031_s5] ss:$0 sm:$0xff] }
 0x202   :  { %v407_v29 = vadd.f32 %v1247_v56, %v406_v28  ;;  %v442_v32 = vmax.f32 %v404_v25, 0.0  ;;  %v1602_v25 = vld [vmem:[%s2030_s6 + $0x38] sm:$0xff]  }
 0x203   :  { %v445_v31 = vmax.f32 %v415_v27, 0.0 }
 0x204   :  { %v443_v33 = vmax.f32 %v407_v29, 0.0 }
 0x205   :  { %v455_v34 = vpack.c.bf16 %v445_v31, %v444_v30 }
 0x206   :  { %v454_v35 = vpack.c.bf16 %v443_v33, %v442_v32  ;;  %v1433_v36 = vpop.f32.mrb[12].mxu1 }
 0x207   :  { %v428_v37 = vadd.f32 %v1433_v36, %v1247_v56  ;;  %v419_v38 = vpop.f32.mrb[13].mxu1 }
 0x208   :  { %v420_v39 = vadd.f32 %v1247_v56, %v419_v38  ;;  %v1434_v40 = vpop.f32.mrb[14].mxu1  ;;  %1459 = vmatprep.mubr.bf16.mxu0 %v454_v35 }
 0x209   :  { %v431_v41 = vadd.f32 %v1434_v40, %v1247_v56  ;;  %v422_v42 = vpop.f32.mrb[15].mxu1  ;;  %1460 = vmatmul.mubr.bf16.gmra.mrb[24].mxu0 %v455_v34  ;;  %v448_v44 = vmax.f32 %v428_v37, 0.0 }
 0x20a   :  { %v423_v43 = vadd.f32 %v1247_v56, %v422_v42  ;;  %v446_v46 = vmax.f32 %v420_v39, 0.0  ;;  %v1597_v56 = vld [vmem:[%s2030_s6 + $0x10] sm:$0xff]  }
 0x20b   :  { %v449_v45 = vmax.f32 %v431_v41, 0.0  ;;  %1503 = vmatprep.subr.bf16.mxu0 %v1597_v56 }
 0x20c   :  { %v447_v54 = vmax.f32 %v423_v43, 0.0  ;;  %1504 = vmatpush3.bf16.msra.mxu0 %v1597_v56 }
 0x20d   :  { %v457_v55 = vpack.c.bf16 %v449_v45, %v448_v44  ;;  %1505 = vmatprep.subr.bf16.mxu0 %v1598_v60 }
 0x20e   :  { %v456_v57 = vpack.c.bf16 %v447_v54, %v446_v46 }
 0x210   :  { %1463 = vmatprep.mubr.bf16.mxu0 %v456_v57  ;;  %1506 = vmatpush3.bf16.msra.mxu0 %v1598_v60 }
 0x211   :  { %1464 = vmatmul.mubr.bf16.gmra.mrb[28].mxu0 %v457_v55  ;;  %1507 = vmatprep.subr.bf16.mxu0 %v1599_v61 }
 0x214   :  { %1508 = vmatpush3.bf16.msra.mxu0 %v1599_v61 }
 0x215   :  { %1509 = vmatprep.subr.bf16.mxu0 %v1600_v62 }
 0x218   :  { %1510 = vmatpush3.bf16.msra.mxu0 %v1600_v62 }
 0x219   :  { %1511 = vmatprep.subr.bf16.mxu0 %v1601_v24 }
 0x21c   :  { %1512 = vmatpush3.bf16.msra.mxu0 %v1601_v24 }
 0x21d   :  { %1513 = vmatprep.subr.bf16.mxu0 %v1602_v25 }
 0x220   :  { %1514 = vmatpush3.bf16.msra.mxu0 %v1602_v25 }
 0x2cc   :  { %v1453_v63 = vpop.f32.mrb[16].mxu0 }
 0x2cd   :  { %v556_v0 = vpop.f32.mrb[17].mxu0 }
 0x2ce   :  { %v1454_v1 = vpop.f32.mrb[18].mxu0 }
 0x2cf   :  { %v620_v2 = vpack.c.bf16 %v1454_v1, %v1453_v63  ;;  %v559_v3 = vpop.f32.mrb[19].mxu0 }
 0x2d0   :  { %v619_v4 = vpack.c.bf16 %v559_v3, %v556_v0 }
 0x2d2   :  { %1467 = vmatprep.subr.bf16.mxu1 %v619_v4 }
 0x2d3   :  { %1468 = vmatpush3.bf16.msra.mxu1 %v619_v4 }
 0x2d4   :  { %v1457_v5 = vpop.f32.mrb[20].mxu0  ;;  %1469 = vmatprep.subr.bf16.mxu1 %v620_v2 }
 0x2d5   :  { %v572_v6 = vpop.f32.mrb[21].mxu0 }
 0x2d6   :  { %v1458_v7 = vpop.f32.mrb[22].mxu0 }
 0x2d7   :  { %v622_v8 = vpack.c.bf16 %v1458_v7, %v1457_v5  ;;  %v575_v9 = vpop.f32.mrb[23].mxu0  ;;  %1470 = vmatpush3.bf16.msra.mxu1 %v620_v2 }
 0x2d8   :  { %v621_v10 = vpack.c.bf16 %v575_v9, %v572_v6 }
 0x2da   :  { %1471 = vmatprep.subr.bf16.mxu1 %v621_v10 }
 0x2db   :  { %1472 = vmatpush3.bf16.msra.mxu1 %v621_v10 }
 0x2dc   :  { %v1461_v11 = vpop.f32.mrb[24].mxu0  ;;  %1473 = vmatprep.subr.bf16.mxu1 %v622_v8 }
 0x2dd   :  { %v588_v12 = vpop.f32.mrb[25].mxu0 }
 0x2de   :  { %v1462_v13 = vpop.f32.mrb[26].mxu0 }
 0x2df   :  { %v624_v14 = vpack.c.bf16 %v1462_v13, %v1461_v11  ;;  %v591_v15 = vpop.f32.mrb[27].mxu0  ;;  %1474 = vmatpush3.bf16.msra.mxu1 %v622_v8 }
 0x2e0   :  { %v623_v17 = vpack.c.bf16 %v591_v15, %v588_v12 }
 0x2e2   :  { %1475 = vmatprep.subr.bf16.mxu1 %v623_v17 }
 0x2e3   :  { %1476 = vmatpush3.bf16.msra.mxu1 %v623_v17 }
 0x2e4   :  { %v1465_v18 = vpop.f32.mrb[28].mxu0  ;;  %1477 = vmatprep.subr.bf16.mxu1 %v624_v14 }
 0x2e5   :  { %v604_v19 = vpop.f32.mrb[29].mxu0 }
 0x2e6   :  { %v1466_v20 = vpop.f32.mrb[30].mxu0 }
 0x2e7   :  { %v626_v21 = vpack.c.bf16 %v1466_v20, %v1465_v18  ;;  %v607_v22 = vpop.f32.mrb[31].mxu0  ;;  %1478 = vmatpush3.bf16.msra.mxu1 %v624_v14 }
 0x2e8   :  { %v625_v23 = vpack.c.bf16 %v607_v22, %v604_v19 }
 0x2ea   :  { %1479 = vmatprep.subr.bf16.mxu1 %v625_v23 }
 0x2eb   :  { %1480 = vmatpush3.bf16.msra.mxu1 %v625_v23 }
 0x2ec   :  { %1481 = vmatprep.subr.bf16.mxu1 %v626_v21 }
 0x2ef   :  { %1482 = vmatpush3.bf16.msra.mxu1 %v626_v21 }
 0x2f2   :  { %1484 = vmatmul.mubr.bf16.vlgmr.msra.gmra.mrb[16].mxu1 %v1792_v47 }
 0x2f3   :  { %1487 = vmatprep.mubr.bf16.mxu1 %v1797_v48 }
 0x2fa   :  { %1488 = vmatmul.mubr.bf16.gmra.mrb[20].mxu1 %v1804_v49 }
 0x2fb   :  { %1491 = vmatprep.mubr.bf16.mxu1 %v1809_v50 }
 0x302   :  { %1492 = vmatmul.mubr.bf16.gmra.mrb[24].mxu1 %v1816_v51 }
 0x303   :  { %1495 = vmatprep.mubr.bf16.mxu1 %v1821_v52 }
 0x30a   :  { %1496 = vmatmul.mubr.bf16.gmra.mrb[28].mxu1 %v1828_v53 }
 0x30b   :  { %1547 = vmatprep.mubr.bf16.mxu1 %v1768_v16 }
 0x3c5   :  { %v1485_v27 = vpop.f32.mrb[16].mxu1 }
 0x3c6   :  { %v677_v28 = vadd.f32 %v1485_v27, %v1264_v26  ;;  %v668_v29 = vpop.f32.mrb[17].mxu1 }
 0x3c7   :  { %v669_v16 = vadd.f32 %v1264_v26, %v668_v29  ;;  %v1486_v30 = vpop.f32.mrb[18].mxu1 }
 0x3c8   :  { %v680_v31 = vadd.f32 %v1486_v30, %v1264_v26  ;;  %v671_v32 = vpop.f32.mrb[19].mxu1  ;;  %v733_v34 = vmax.f32 %v677_v28, 0.0 }
 0x3c9   :  { %v672_v33 = vadd.f32 %v1264_v26, %v671_v32  ;;  %v731_v36 = vmax.f32 %v669_v16, 0.0 }
 0x3ca   :  { %v734_v35 = vmax.f32 %v680_v31, 0.0 }
 0x3cb   :  { %v732_v37 = vmax.f32 %v672_v33, 0.0 }
 0x3cc   :  { %v748_v38 = vpack.c.bf16 %v734_v35, %v733_v34 }
 0x3cd   :  { %v747_v39 = vpack.c.bf16 %v732_v37, %v731_v36  ;;  %v1489_v40 = vpop.f32.mrb[20].mxu1 }
 0x3ce   :  { %v693_v41 = vadd.f32 %v1489_v40, %v1264_v26  ;;  %v684_v42 = vpop.f32.mrb[21].mxu1 }
 0x3cf   :  { %v685_v43 = vadd.f32 %v1264_v26, %v684_v42  ;;  %v1490_v44 = vpop.f32.mrb[22].mxu1  ;;  %1515 = vmatprep.mubr.bf16.mxu0 %v747_v39 }
 0x3d0   :  { %v696_v45 = vadd.f32 %v1490_v44, %v1264_v26  ;;  %v687_v46 = vpop.f32.mrb[23].mxu1  ;;  %1516 = vmatmul.mubr.bf16.vlgmr.msra.gmra.mrb[32].mxu0 %v748_v38  ;;  %v737_v55 = vmax.f32 %v693_v41, 0.0 }
 0x3d1   :  { %v688_v54 = vadd.f32 %v1264_v26, %v687_v46  ;;  %v735_v58 = vmax.f32 %v685_v43, 0.0 }
 0x3d2   :  { %v738_v57 = vmax.f32 %v696_v45, 0.0 }
 0x3d3   :  { %v736_v59 = vmax.f32 %v688_v54, 0.0 }
 0x3d4   :  { %v750_v56 = vpack.c.bf16 %v738_v57, %v737_v55  ;;  %v1273_v57 = vld [vmem:[%s2032_s7] ss:$0 sm:$0xff] }
 0x3d5   :  { %v749_v60 = vpack.c.bf16 %v736_v59, %v735_v58  ;;  %v1493_v61 = vpop.f32.mrb[24].mxu1 }
 0x3d6   :  { %v709_v62 = vadd.f32 %v1493_v61, %v1264_v26  ;;  %v700_v63 = vpop.f32.mrb[25].mxu1 }
 0x3d7   :  { %v701_v0 = vadd.f32 %v1264_v26, %v700_v63  ;;  %v1494_v1 = vpop.f32.mrb[26].mxu1  ;;  %1519 = vmatprep.mubr.bf16.mxu0 %v749_v60 }
 0x3d8   :  { %v712_v2 = vadd.f32 %v1494_v1, %v1264_v26  ;;  %v703_v3 = vpop.f32.mrb[27].mxu1  ;;  %1520 = vmatmul.mubr.bf16.gmra.mrb[36].mxu0 %v750_v56  ;;  %v741_v5 = vmax.f32 %v709_v62, 0.0 }
 0x3d9   :  { %v704_v4 = vadd.f32 %v1264_v26, %v703_v3  ;;  %v739_v7 = vmax.f32 %v701_v0, 0.0 }
 0x3da   :  { %v742_v6 = vmax.f32 %v712_v2, 0.0 }
 0x3db   :  { %v740_v8 = vmax.f32 %v704_v4, 0.0 }
 0x3dc   :  { %v752_v9 = vpack.c.bf16 %v742_v6, %v741_v5 }
 0x3dd   :  { %v751_v10 = vpack.c.bf16 %v740_v8, %v739_v7  ;;  %v1497_v11 = vpop.f32.mrb[28].mxu1 }
 0x3de   :  { %v725_v12 = vadd.f32 %v1497_v11, %v1264_v26  ;;  %v716_v13 = vpop.f32.mrb[29].mxu1 }
 0x3df   :  { %v717_v14 = vadd.f32 %v1264_v26, %v716_v13  ;;  %v1498_v15 = vpop.f32.mrb[30].mxu1  ;;  %1523 = vmatprep.mubr.bf16.mxu0 %v751_v10 }
 0x3e0   :  { %v728_v17 = vadd.f32 %v1498_v15, %v1264_v26  ;;  %v719_v18 = vpop.f32.mrb[31].mxu1  ;;  %1524 = vmatmul.mubr.bf16.gmra.mrb[40].mxu0 %v752_v9  ;;  %v745_v20 = vmax.f32 %v725_v12, 0.0 }
 0x3e1   :  { %v720_v19 = vadd.f32 %v1264_v26, %v719_v18  ;;  %v743_v22 = vmax.f32 %v717_v14, 0.0 }
 0x3e2   :  { %v746_v21 = vmax.f32 %v728_v17, 0.0 }
 0x3e3   :  { %v744_v23 = vmax.f32 %v720_v19, 0.0 }
 0x3e4   :  { %v754_v24 = vpack.c.bf16 %v746_v21, %v745_v20 }
 0x3e5   :  { %v753_v25 = vpack.c.bf16 %v744_v23, %v743_v22 }
 0x3e7   :  { %1527 = vmatprep.mubr.bf16.mxu0 %v753_v25 }
 0x3e8   :  { %1528 = vmatmul.mubr.bf16.gmra.mrb[44].mxu0 %v754_v24 }
 0x4a3   :  { %v1517_v27 = vpop.f32.mrb[32].mxu0 }
 0x4a4   :  { %v853_v28 = vpop.f32.mrb[33].mxu0 }
 0x4a5   :  { %v1518_v29 = vpop.f32.mrb[34].mxu0 }
 0x4a6   :  { %v917_v16 = vpack.c.bf16 %v1518_v29, %v1517_v27  ;;  %v856_v30 = vpop.f32.mrb[35].mxu0 }
 0x4a7   :  { %v916_v31 = vpack.c.bf16 %v856_v30, %v853_v28 }
 0x4a9   :  { %1531 = vmatprep.subr.bf16.mxu1 %v916_v31 }
 0x4aa   :  { %1532 = vmatpush3.bf16.msra.mxu1 %v916_v31 }
 0x4ab   :  { %v1521_v32 = vpop.f32.mrb[36].mxu0  ;;  %1533 = vmatprep.subr.bf16.mxu1 %v917_v16 }
 0x4ac   :  { %v869_v33 = vpop.f32.mrb[37].mxu0 }
 0x4ad   :  { %v1522_v26 = vpop.f32.mrb[38].mxu0 }
 0x4ae   :  { %v919_v34 = vpack.c.bf16 %v1522_v26, %v1521_v32  ;;  %v872_v35 = vpop.f32.mrb[39].mxu0  ;;  %1534 = vmatpush3.bf16.msra.mxu1 %v917_v16 }
 0x4af   :  { %v918_v36 = vpack.c.bf16 %v872_v35, %v869_v33 }
 0x4b1   :  { %1535 = vmatprep.subr.bf16.mxu1 %v918_v36 }
 0x4b2   :  { %1536 = vmatpush3.bf16.msra.mxu1 %v918_v36 }
 0x4b3   :  { %v1525_v37 = vpop.f32.mrb[40].mxu0  ;;  %1537 = vmatprep.subr.bf16.mxu1 %v919_v34 }
 0x4b4   :  { %v885_v38 = vpop.f32.mrb[41].mxu0 }
 0x4b5   :  { %v1526_v39 = vpop.f32.mrb[42].mxu0 }
 0x4b6   :  { %v921_v40 = vpack.c.bf16 %v1526_v39, %v1525_v37  ;;  %v888_v41 = vpop.f32.mrb[43].mxu0  ;;  %1538 = vmatpush3.bf16.msra.mxu1 %v919_v34 }
 0x4b7   :  { %v920_v42 = vpack.c.bf16 %v888_v41, %v885_v38 }
 0x4b9   :  { %1539 = vmatprep.subr.bf16.mxu1 %v920_v42 }
 0x4ba   :  { %1540 = vmatpush3.bf16.msra.mxu1 %v920_v42 }
 0x4bb   :  { %v1529_v43 = vpop.f32.mrb[44].mxu0  ;;  %1541 = vmatprep.subr.bf16.mxu1 %v921_v40 }
 0x4bc   :  { %v901_v44 = vpop.f32.mrb[45].mxu0 }
 0x4bd   :  { %v1530_v45 = vpop.f32.mrb[46].mxu0 }
 0x4be   :  { %v923_v46 = vpack.c.bf16 %v1530_v45, %v1529_v43  ;;  %v904_v54 = vpop.f32.mrb[47].mxu0  ;;  %1542 = vmatpush3.bf16.msra.mxu1 %v921_v40 }
 0x4bf   :  { %v922_v55 = vpack.c.bf16 %v904_v54, %v901_v44 }
 0x4c1   :  { %1543 = vmatprep.subr.bf16.mxu1 %v922_v55 }
 0x4c2   :  { %1544 = vmatpush3.bf16.msra.mxu1 %v922_v55 }
 0x4c3   :  { %1545 = vmatprep.subr.bf16.mxu1 %v923_v46 }
 0x4c6   :  { %1546 = vmatpush3.bf16.msra.mxu1 %v923_v46 }
 0x4c9   :  { %1548 = vmatmul.mubr.bf16.vlgmr.msra.gmra.mrb[32].mxu1 %v1792_v47  ;;  %v1274_v47 = vld [vmem:[%s2033_s8] ss:$0 sm:$0xff] }
 0x4ca   :  { %1551 = vmatprep.mubr.bf16.mxu1 %v1797_v48 }
 0x4d1   :  { %1552 = vmatmul.mubr.bf16.gmra.mrb[36].mxu1 %v1804_v49 }
 0x4d2   :  { %1555 = vmatprep.mubr.bf16.mxu1 %v1809_v50 }
 0x4d9   :  { %1556 = vmatmul.mubr.bf16.gmra.mrb[40].mxu1 %v1816_v51 }
 0x4da   :  { %1559 = vmatprep.mubr.bf16.mxu1 %v1821_v52 }
 0x4e1   :  { %1560 = vmatmul.mubr.bf16.gmra.mrb[44].mxu1 %v1828_v53 }
 0x59c   :  { %v1549_v58 = vpop.f32.mrb[32].mxu1 }
 0x59d   :  { %v974_v48 = vadd.f32 %v1549_v58, %v1273_v57  ;;  %v965_v59 = vpop.f32.mrb[33].mxu1 }
 0x59e   :  { %v966_v49 = vadd.f32 %v1273_v57, %v965_v59  ;;  %v1550_v56 = vpop.f32.mrb[34].mxu1 }
 0x59f   :  { %v977_v50 = vadd.f32 %v1550_v56, %v1273_v57  ;;  %v968_v60 = vpop.f32.mrb[35].mxu1  ;;  %v1037_v51 = vadd.f32 %v1274_v47, %v974_v48 }
 0x5a0   :  { %v969_v61 = vadd.f32 %v1273_v57, %v968_v60  ;;  %v1035_v52 = vadd.f32 %v1274_v47, %v966_v49 }
 0x5a1   :  { %1055 = vmax.xlane.f32.xlu1 %v1037_v51  ;;  %v1038_v53 = vadd.f32 %v1274_v47, %v977_v50 }
 0x5a2   :  { %1051 = vmax.xlane.f32.xlu0 %v1035_v52  ;;  %v1036_v63 = vadd.f32 %v1274_v47, %v969_v61 }
 0x5a4   :  { %v1553_v62 = vpop.f32.mrb[36].mxu1 }
 0x5a5   :  { %v990_v0 = vadd.f32 %v1553_v62, %v1273_v57  ;;  %1057 = vmax.xlane.f32.xlu1 %v1038_v53  ;;  %v981_v1 = vpop.f32.mrb[37].mxu1 }
 0x5a6   :  { %v1554_v2 = vpop.f32.mrb[38].mxu1  ;;  %1053 = vmax.xlane.f32.xlu0 %v1036_v63  ;;  %v982_v6 = vadd.f32 %v1273_v57, %v981_v1 }
 0x5a7   :  { %v993_v3 = vadd.f32 %v1554_v2, %v1273_v57  ;;  %v984_v4 = vpop.f32.mrb[39].mxu1  ;;  %v1041_v5 = vadd.f32 %v1274_v47, %v990_v0 }
 0x5a8   :  { %v985_v7 = vadd.f32 %v1273_v57, %v984_v4  ;;  %v1039_v10 = vadd.f32 %v1274_v47, %v982_v6 }
 0x5a9   :  { %v1042_v8 = vadd.f32 %v1274_v47, %v993_v3 }
 0x5aa   :  { %1063 = vmax.xlane.f32.xlu0 %v1041_v5  ;;  %v1040_v13 = vadd.f32 %v1274_v47, %v985_v7 }
 0x5ab   :  { %1065 = vmax.xlane.f32.xlu1 %v1042_v8 }
 0x5ac   :  { %v1557_v9 = vpop.f32.mrb[40].mxu1 }
 0x5ad   :  { %v1006_v11 = vadd.f32 %v1557_v9, %v1273_v57  ;;  %v997_v12 = vpop.f32.mrb[41].mxu1 }
 0x5ae   :  { %v1558_v14 = vpop.f32.mrb[42].mxu1  ;;  %1059 = vmax.xlane.f32.xlu0 %v1039_v10  ;;  %v998_v19 = vadd.f32 %v1273_v57, %v997_v12 }
 0x5af   :  { %v1009_v15 = vadd.f32 %v1558_v14, %v1273_v57  ;;  %v1000_v17 = vpop.f32.mrb[43].mxu1  ;;  %1061 = vmax.xlane.f32.xlu1 %v1040_v13  ;;  %v1045_v18 = vadd.f32 %v1274_v47, %v1006_v11 }
 0x5b0   :  { %v1001_v20 = vadd.f32 %v1273_v57, %v1000_v17  ;;  %v1889_v23 = vadd.f32 %v1274_v47, %v998_v19 }
 0x5b1   :  { %v1046_v21 = vadd.f32 %v1274_v47, %v1009_v15 }
 0x5b2   :  { %1071 = vmax.xlane.f32.xlu0 %v1045_v18  ;;  %v1891_v25 = vadd.f32 %v1274_v47, %v1001_v20 }
 0x5b3   :  { %1073 = vmax.xlane.f32.xlu1 %v1046_v21 }
 0x5b4   :  { %v1561_v22 = vpop.f32.mrb[44].mxu1 }
 0x5b5   :  { %v1013_v24 = vpop.f32.mrb[45].mxu1  ;;  %v1022_v16 = vadd.f32 %v1561_v22, %v1273_v57 }
 0x5b6   :  { %v1014_v27 = vadd.f32 %v1273_v57, %v1013_v24  ;;  %v1562_v28 = vpop.f32.mrb[46].mxu1  ;;  %1067 = vmax.xlane.f32.xlu0 %v1889_v23 }
 0x5b7   :  { %v1016_v29 = vpop.f32.mrb[47].mxu1  ;;  %1069 = vmax.xlane.f32.xlu1 %v1891_v25  ;;  %v1025_v32 = vadd.f32 %v1562_v28, %v1273_v57  ;;  %v1901_v26 = vadd.f32 %v1274_v47, %v1022_v16 }
 0x5b8   :  { %v1017_v30 = vadd.f32 %v1273_v57, %v1016_v29  ;;  %v1895_v31 = vadd.f32 %v1274_v47, %v1014_v27 }
 0x5b9   :  { %v1904_v34 = vadd.f32 %v1274_v47, %v1025_v32 }
 0x5ba   :  { %1075 = vmax.xlane.f32.xlu0 %v1895_v31  ;;  %v1898_v33 = vadd.f32 %v1274_v47, %v1017_v30 }
 0x5bc   :  { %1077 = vmax.xlane.f32.xlu1 %v1898_v33 }
 0x5be   :  { %1079 = vmax.xlane.f32.xlu0 %v1901_v26 }
 0x5c0   :  { %1081 = vmax.xlane.f32.xlu1 %v1904_v34 }
 0x62e   :  { %v1056_v35 = vpop.xlane.xlu1 %1055 }
 0x62f   :  { %v1907_v36 = vsub.f32 %v1037_v51, %v1056_v35  ;;  %v1052_v37 = vpop.xlane.xlu0 %1051 }
 0x630   :  { %v1909_v38 = vsub.f32 %v1035_v52, %v1052_v37 }
 0x631   :  { %v1103_v39 = vmul.f32 1.442695, %v1907_v36 }
 0x632   :  { %v1099_v40 = vmul.f32 1.442695, %v1909_v38  ;;  %v1058_v41 = vpop.xlane.xlu1 %1057 }
 0x633   :  { %1603 = vpow2.f32 %v1103_v39  ;;  %v1913_v42 = vsub.f32 %v1038_v53, %v1058_v41  ;;  %v1054_v43 = vpop.xlane.xlu0 %1053 }
 0x634   :  { %v1915_v44 = vsub.f32 %v1036_v63, %v1054_v43  ;;  %1605 = vpow2.f32 %v1099_v40 }
 0x635   :  { %v1105_v45 = vmul.f32 1.442695, %v1913_v42 }
 0x636   :  { %v1101_v46 = vmul.f32 1.442695, %v1915_v44 }
 0x637   :  { %1607 = vpow2.f32 %v1105_v45  ;;  %v1064_v54 = vpop.xlane.xlu0 %1063 }
 0x638   :  { %v1919_v55 = vsub.f32 %v1041_v5, %v1064_v54  ;;  %v1066_v57 = vpop.xlane.xlu1 %1065  ;;  %1609 = vpow2.f32 %v1101_v46 }
 0x639   :  { %v1921_v58 = vsub.f32 %v1042_v8, %v1066_v57 }
 0x63a   :  { %v1111_v47 = vmul.f32 1.442695, %v1919_v55 }
 0x63b   :  { %v1113_v48 = vmul.f32 1.442695, %v1921_v58  ;;  %v1060_v59 = vpop.xlane.xlu0 %1059 }
 0x63c   :  { %1611 = vpow2.f32 %v1111_v47  ;;  %v1925_v49 = vsub.f32 %v1039_v10, %v1060_v59  ;;  %v1062_v56 = vpop.xlane.xlu1 %1061 }
 0x63d   :  { %v1604_v50 = vpop.eup %1603  ;;  %v1927_v60 = vsub.f32 %v1040_v13, %v1062_v56  ;;  %1613 = vpow2.f32 %v1113_v48 }
 0x63e   :  { %v1107_v51 = vmul.f32 1.442695, %v1925_v49  ;;  %1135 = vadd.xlane.f32.xlu0 %v1604_v50  ;;  %v1606_v53 = vpop.eup %1605 }
 0x63f   :  { %v1109_v61 = vmul.f32 1.442695, %v1927_v60  ;;  %v1072_v52 = vpop.xlane.xlu0 %1071 }
 0x640   :  { %1615 = vpow2.f32 %v1107_v51  ;;  %v1931_v62 = vsub.f32 %v1045_v18, %v1072_v52  ;;  %v1074_v63 = vpop.xlane.xlu1 %1073 }
 0x641   :  { %v1608_v0 = vpop.eup %1607  ;;  %v1933_v1 = vsub.f32 %v1046_v21, %v1074_v63  ;;  %1617 = vpow2.f32 %v1109_v61 }
 0x642   :  { %v1119_v2 = vmul.f32 1.442695, %v1931_v62  ;;  %1137 = vadd.xlane.f32.xlu1 %v1608_v0  ;;  %1131 = vadd.xlane.f32.xlu0 %v1606_v53  ;;  %v1610_v7 = vpop.eup %1609 }
 0x643   :  { %v1121_v3 = vmul.f32 1.442695, %v1933_v1  ;;  %v1068_v4 = vpop.xlane.xlu0 %1067 }
 0x644   :  { %1619 = vpow2.f32 %v1119_v2  ;;  %v1938_v5 = vsub.f32 %v1889_v23, %v1068_v4  ;;  %v1070_v6 = vpop.xlane.xlu1 %1069 }
 0x645   :  { %v1941_v8 = vsub.f32 %v1891_v25, %v1070_v6  ;;  %1621 = vpow2.f32 %v1121_v3 }
 0x646   :  { %v1612_v9 = vpop.eup %1611  ;;  %v1115_v10 = vmul.f32 1.442695, %v1938_v5  ;;  %1133 = vadd.xlane.f32.xlu1 %v1610_v7 }
 0x647   :  { %v1117_v11 = vmul.f32 1.442695, %v1941_v8  ;;  %1143 = vadd.xlane.f32.xlu0 %v1612_v9  ;;  %v1076_v12 = vpop.xlane.xlu0 %1075  ;;  %v1614_v14 = vpop.eup %1613 }
 0x648   :  { %1623 = vpow2.f32 %v1115_v10  ;;  %v1946_v13 = vsub.f32 %v1895_v31, %v1076_v12 }
 0x649   :  { %v1078_v15 = vpop.xlane.xlu1 %1077  ;;  %1625 = vpow2.f32 %v1117_v11 }
 0x64a   :  { %v1616_v17 = vpop.eup %1615  ;;  %v1123_v18 = vmul.f32 1.442695, %v1946_v13  ;;  %v1950_v19 = vsub.f32 %v1898_v33, %v1078_v15  ;;  %1145 = vadd.xlane.f32.xlu1 %v1614_v14 }
 0x64b   :  { %1139 = vadd.xlane.f32.xlu0 %v1616_v17  ;;  %v1080_v20 = vpop.xlane.xlu0 %1079  ;;  %v1618_v23 = vpop.eup %1617 }
 0x64c   :  { %1627 = vpow2.f32 %v1123_v18  ;;  %v1125_v21 = vmul.f32 1.442695, %v1950_v19  ;;  %v1954_v22 = vsub.f32 %v1901_v26, %v1080_v20 }
 0x64d   :  { %v1082_v24 = vpop.xlane.xlu1 %1081 }
 0x64e   :  { %v1620_v25 = vpop.eup %1619  ;;  %1629 = vpow2.f32 %v1125_v21  ;;  %v1127_v27 = vmul.f32 1.442695, %v1954_v22  ;;  %v1958_v28 = vsub.f32 %v1904_v34, %v1082_v24  ;;  %1141 = vadd.xlane.f32.xlu1 %v1618_v23 }
 0x64f   :  { %1151 = vadd.xlane.f32.xlu0 %v1620_v25  ;;  %v1622_v16 = vpop.eup %1621 }
 0x650   :  { %1631 = vpow2.f32 %v1127_v27  ;;  %v1129_v29 = vmul.f32 1.442695, %v1958_v28 }
 0x652   :  { %v1624_v30 = vpop.eup %1623  ;;  %1633 = vpow2.f32 %v1129_v29  ;;  %1153 = vadd.xlane.f32.xlu1 %v1622_v16 }
 0x653   :  { %1147 = vadd.xlane.f32.xlu0 %v1624_v30  ;;  %v1626_v31 = vpop.eup %1625 }
 0x656   :  { %v1628_v32 = vpop.eup %1627  ;;  %1149 = vadd.xlane.f32.xlu1 %v1626_v31 }
 0x657   :  { %1155 = vadd.xlane.f32.xlu0 %v1628_v32 }
 0x658   :  { %v1630_v33 = vpop.eup %1629 }
 0x65a   :  { %v1632_v26 = vpop.eup %1631  ;;  %1157 = vadd.xlane.f32.xlu1 %v1630_v33 }
 0x65b   :  { %1159 = vadd.xlane.f32.xlu0 %v1632_v26 }
 0x65c   :  { %v1634_v34 = vpop.eup %1633 }
 0x65e   :  { %1161 = vadd.xlane.f32.xlu1 %v1634_v34 }
 0x6cb   :  { %v1136_v35 = vpop.xlane.xlu0 %1135 }
 0x6cc   :  { %1635 = vlog2.f32 %v1136_v35 }
 0x6cf   :  { %v1138_v37 = vpop.xlane.xlu1 %1137  ;;  %v1132_v39 = vpop.xlane.xlu0 %1131 }
 0x6d0   :  { %1637 = vlog2.f32 %v1138_v37 }
 0x6d1   :  { %1639 = vlog2.f32 %v1132_v39 }
 0x6d3   :  { %v1134_v40 = vpop.xlane.xlu1 %1133 }
 0x6d4   :  { %1641 = vlog2.f32 %v1134_v40  ;;  %v1144_v41 = vpop.xlane.xlu0 %1143 }
 0x6d5   :  { %1643 = vlog2.f32 %v1144_v41 }
 0x6d6   :  { %v1636_v43 = vpop.eup %1635 }
 0x6d7   :  { %v1168_v45 = vmul.f32 0.6931472, %v1636_v43  ;;  %v1146_v46 = vpop.xlane.xlu1 %1145 }
 0x6d8   :  { %1645 = vlog2.f32 %v1146_v46  ;;  %v1140_v54 = vpop.xlane.xlu0 %1139 }
 0x6d9   :  { %v1197_v57 = vsub.f32 %v1907_v36, %v1168_v45  ;;  %1647 = vlog2.f32 %v1140_v54 }
 0x6da   :  { %v1638_v47 = vpop.eup %1637 }
 0x6db   :  { %v1640_v48 = vpop.eup %1639  ;;  %1213 = vst [vmem:[%s2034_s9 + $0x10] sm:$0xff] %v1197_v57  ;;  %v1170_v59 = vmul.f32 0.6931472, %v1638_v47  ;;  %v1142_v56 = vpop.xlane.xlu1 %1141 }
 0x6dc   :  { %v1164_v50 = vmul.f32 0.6931472, %v1640_v48  ;;  %1649 = vlog2.f32 %v1142_v56  ;;  %v1152_v51 = vpop.xlane.xlu0 %1151 }
 0x6dd   :  { %v1198_v61 = vsub.f32 %v1913_v42, %v1170_v59  ;;  %1651 = vlog2.f32 %v1152_v51 }
 0x6de   :  { %v1642_v52 = vpop.eup %1641  ;;  %v1195_v53 = vsub.f32 %v1909_v38, %v1164_v50 }
 0x6df   :  { %v1644_v63 = vpop.eup %1643  ;;  %1214 = vst [vmem:[%s2034_s9 + $0x18] sm:$0xff] %v1198_v61  ;;  %v1166_v36 = vmul.f32 0.6931472, %v1642_v52  ;;  %v1154_v0 = vpop.xlane.xlu1 %1153 }
 0x6e0   :  { %1211 = vst [vmem:[%s2034_s9] sm:$0xff] %v1195_v53  ;;  %v1176_v2 = vmul.f32 0.6931472, %v1644_v63  ;;  %1653 = vlog2.f32 %v1154_v0  ;;  %v1148_v3 = vpop.xlane.xlu0 %1147 }
 0x6e1   :  { %v1196_v42 = vsub.f32 %v1915_v44, %v1166_v36  ;;  %1655 = vlog2.f32 %v1148_v3 }
 0x6e2   :  { %v1646_v4 = vpop.eup %1645  ;;  %v1201_v38 = vsub.f32 %v1919_v55, %v1176_v2 }
 0x6e3   :  { %v1648_v6 = vpop.eup %1647  ;;  %1212 = vst [vmem:[%s2034_s9 + $0x8] sm:$0xff] %v1196_v42  ;;  %v1178_v7 = vmul.f32 0.6931472, %v1646_v4  ;;  %v1150_v9 = vpop.xlane.xlu1 %1149 }
 0x6e4   :  { %1217 = vst [vmem:[%s2034_s9 + $0x30] sm:$0xff] %v1201_v38  ;;  %v1172_v10 = vmul.f32 0.6931472, %v1648_v6  ;;  %1657 = vlog2.f32 %v1150_v9  ;;  %v1156_v11 = vpop.xlane.xlu0 %1155 }
 0x6e5   :  { %v1202_v44 = vsub.f32 %v1921_v58, %v1178_v7  ;;  %1659 = vlog2.f32 %v1156_v11 }
 0x6e6   :  { %v1650_v12 = vpop.eup %1649  ;;  %v1199_v55 = vsub.f32 %v1925_v49, %v1172_v10 }
 0x6e7   :  { %v1652_v14 = vpop.eup %1651  ;;  %1218 = vst [vmem:[%s2034_s9 + $0x38] sm:$0xff] %v1202_v44  ;;  %v1174_v15 = vmul.f32 0.6931472, %v1650_v12  ;;  %v1158_v17 = vpop.xlane.xlu1 %1157 }
 0x6e8   :  { %1215 = vst [vmem:[%s2034_s9 + $0x20] sm:$0xff] %v1199_v55  ;;  %v1184_v18 = vmul.f32 0.6931472, %v1652_v14  ;;  %1661 = vlog2.f32 %v1158_v17  ;;  %v1160_v20 = vpop.xlane.xlu0 %1159 }
 0x6e9   :  { %v1200_v58 = vsub.f32 %v1927_v60, %v1174_v15  ;;  %1663 = vlog2.f32 %v1160_v20 }
 0x6ea   :  { %v1654_v21 = vpop.eup %1653  ;;  %v1205_v49 = vsub.f32 %v1931_v62, %v1184_v18 }
 0x6eb   :  { %v1656_v23 = vpop.eup %1655  ;;  %1216 = vst [vmem:[%s2034_s9 + $0x28] sm:$0xff] %v1200_v58  ;;  %v1186_v24 = vmul.f32 0.6931472, %v1654_v21  ;;  %v1162_v25 = vpop.xlane.xlu1 %1161 }
 0x6ec   :  { %1221 = vst [vmem:[%s2034_s9 + $0x50] sm:$0xff] %v1205_v49  ;;  %v1180_v27 = vmul.f32 0.6931472, %v1656_v23  ;;  %1665 = vlog2.f32 %v1162_v25 }
 0x6ed   :  { %v1206_v29 = vsub.f32 %v1933_v1, %v1186_v24 }
 0x6ee   :  { %v1658_v60 = vpop.eup %1657  ;;  %v1203_v16 = vsub.f32 %v1938_v5, %v1180_v27 }
 0x6ef   :  { %v1660_v30 = vpop.eup %1659  ;;  %1222 = vst [vmem:[%s2034_s9 + $0x58] sm:$0xff] %v1206_v29  ;;  %v1182_v62 = vmul.f32 0.6931472, %v1658_v60 }
 0x6f0   :  { %1219 = vst [vmem:[%s2034_s9 + $0x40] sm:$0xff] %v1203_v16  ;;  %v1188_v31 = vmul.f32 0.6931472, %v1660_v30 }
 0x6f1   :  { %v1204_v32 = vsub.f32 %v1941_v8, %v1182_v62 }
 0x6f2   :  { %v1662_v33 = vpop.eup %1661  ;;  %v1207_v26 = vsub.f32 %v1946_v13, %v1188_v31 }
 0x6f3   :  { %v1664_v1 = vpop.eup %1663  ;;  %1220 = vst [vmem:[%s2034_s9 + $0x48] sm:$0xff] %v1204_v32  ;;  %v1190_v5 = vmul.f32 0.6931472, %v1662_v33 }
 0x6f4   :  { %1223 = vst [vmem:[%s2034_s9 + $0x60] sm:$0xff] %v1207_v26  ;;  %v1192_v34 = vmul.f32 0.6931472, %v1664_v1 }
 0x6f5   :  { %v1208_v35 = vsub.f32 %v1950_v19, %v1190_v5 }
 0x6f6   :  { %v1666_v37 = vpop.eup %1665  ;;  %v1209_v39 = vsub.f32 %v1954_v22, %v1192_v34 }
 0x6f7   :  { %1224 = vst [vmem:[%s2034_s9 + $0x68] sm:$0xff] %v1208_v35  ;;  %v1194_v8 = vmul.f32 0.6931472, %v1666_v37 }
 0x6f8   :  { %1225 = vst [vmem:[%s2034_s9 + $0x70] sm:$0xff] %v1209_v39 }
 0x6f9   :  { %v1210_v13 = vsub.f32 %v1958_v28, %v1194_v8 }
 0x6fb   :  { %1226 = vst [vmem:[%s2034_s9 + $0x78] sm:$0xff] %v1210_v13 }

</bundles_post_ra>
